<compile_context>
chip_gen: v5e
topology: v5e:2x2
jax: 0.10.0
libtpu: 0.0.40
codegen_flags: <defaults>
</compile_context>

<pallas_src>
import functools

import jax
import jax.numpy as jnp
import numpy as np
from jax import lax
from jax.experimental import pallas as pl
from jax.experimental.pallas import tpu as pltpu


def _round_up(v, m):
    return ((v + m - 1) // m) * m


def sp_attention_kernel(x_ref, adj_ref, y_ref, gadj_ref,
                        wt_ref, wg_ref, wa1_ref, wa2t_ref,
                        xo_ref, yo_ref, *, rowsum_col):
    f32 = jnp.float32

    # --- GraphConvolution (row tile): y_out = gcn_adj[rows] @ (y @ Wg) -----
    m = jnp.dot(y_ref[...], wg_ref[...], preferred_element_type=f32)        # (N, Lp)
    y_out = jnp.dot(gadj_ref[...], m, preferred_element_type=f32)           # (tm, Lp)
    yo_ref[...] = y_out

    # --- node feature transform (all N columns needed by this row tile) ----
    xt = jnp.dot(x_ref[...], wt_ref[...], preferred_element_type=f32)       # (N, Fp)

    # --- edge attention logits: e[i, j] = a1 . trans(y)[i] + a2 . xt[j] ----
    # a1 / a2 were pre-folded into the linear layers in the wrapper
    # (wa1 = Wtr @ a1^T, wa2t = (Wt @ a2^T)^T) -> two skinny MXU matmuls.
    s1 = jnp.dot(y_out, wa1_ref[...], preferred_element_type=f32)           # (tm, 1)
    s2 = lax.dot_general(wa2t_ref[...], x_ref[...],
                         (((1,), (1,)), ((), ())),
                         preferred_element_type=f32)                        # (1, N)
    e = s1 + s2                                                             # (tm, N)

    # --- per-edge weights: h = exp(tanh(e)) on edges, 0 elsewhere ----------
    # TODO(synk): training-mode F.dropout on h and x (identity in eval mode)
    #             is not implemented.
    # TODO(synk): block-sparse skipping of all-zero adjacency tiles via
    #             scalar-prefetched block flags would cut the EUP-bound
    #             exp/tanh cost proportionally to graph sparsity.
    h = jnp.where(adj_ref[...] != 0.0, jnp.exp(jnp.tanh(e)), 0.0)           # (tm, N)

    # --- special_spmm: one matmul gives both H @ xt and the row-sum --------
    # Column `rowsum_col` of the padded xt is all zeros (weight zero-padding);
    # set it to 1 so the same MXU pass also produces rowsum = H @ ones.
    col = lax.broadcasted_iota(jnp.int32, xt.shape, 1)
    xt_aug = jnp.where(col == rowsum_col, 1.0, xt)                          # (N, Fp)
    num = jnp.dot(h, xt_aug, preferred_element_type=f32)                    # (tm, Fp)
    rowsum = num[:, rowsum_col:rowsum_col + 1]                              # (tm, 1)
    # Rows with no edges (rowsum == 0) give inf/nan exactly like the PyTorch
    # module; the caller must provide self-loops.
    xo_ref[...] = num / rowsum


def sp_attention_forward(x, adj, y, gcn_adj, params, *, row_tile=None):
    N, in_f = x.shape
    label_f = y.shape[1]
    out_f = params["wt"].shape[1]
    label_out_f = params["wg"].shape[1]
    f32 = jnp.float32
    hi = lax.Precision.HIGHEST

    # Lane-dense padding of the feature dims; keep one zero lane free for the
    # fused rowsum column.
    F_pad = _round_up(out_f, 128)
    if F_pad == out_f:
        F_pad += 128
    L_pad = _round_up(label_out_f, 128)

    wt_p = jnp.zeros((in_f, F_pad), f32).at[:, :out_f].set(params["wt"].astype(f32))
    wg_p = jnp.zeros((label_f, L_pad), f32).at[:, :label_out_f].set(params["wg"].astype(f32))
    # Fold the attention vector halves into the linear layers.
    wa1_core = jnp.dot(params["wtr"], params["a1"].T, precision=hi)          # (Lout, 1)
    wa1 = jnp.zeros((L_pad, 1), f32).at[:label_out_f, :].set(wa1_core.astype(f32))
    wa2t = jnp.dot(params["wt"], params["a2"].T, precision=hi).T.astype(f32)  # (1, in_f)

    # Row tile: largest divisor of N from the preference list (multiple of 8).
    if row_tile is None:
        for t in (512, 256, 128, 64, 32, 16, 8):
            if N % t == 0:
                row_tile = t
                break
        else:
            row_tile = N
    tm = row_tile
    assert N % tm == 0, "row_tile must divide N"
    grid = (N // tm,)

    # Explicit VMEM budget: streamed tiles (x2 pipeline buffers) + residents
    # + in-kernel temporaries, with 2x headroom, clamped to [32 MiB, 100 MiB].
    fb = 4  # f32 bytes
    vmem = (2 * 2 * tm * N * fb                           # adj + gcn_adj row tiles
            + 2 * N * (in_f + label_f) * fb               # resident x, y
            + 2 * (in_f * F_pad + label_f * L_pad + L_pad + in_f) * fb  # weights
            + 2 * 2 * tm * (F_pad + L_pad) * fb           # output tiles
            + (2 * tm * N + 2 * N * F_pad + N * L_pad + 2 * tm * L_pad) * fb)  # temps
    vmem_limit = int(min(max(2 * vmem, 32 << 20), 100 << 20))

    kernel = functools.partial(sp_attention_kernel, rowsum_col=out_f)

    xo_p, yo_p = pl.pallas_call(
        kernel,
        out_shape=(
            jax.ShapeDtypeStruct((N, F_pad), f32),
            jax.ShapeDtypeStruct((N, L_pad), f32),
        ),
        grid_spec=pltpu.PrefetchScalarGridSpec(
            num_scalar_prefetch=0,
            grid=grid,
            in_specs=[
                pl.BlockSpec((N, in_f), lambda i: (0, 0)),        # x (resident)
                pl.BlockSpec((tm, N), lambda i: (i, 0)),          # adj row tile
                pl.BlockSpec((N, label_f), lambda i: (0, 0)),     # y (resident)
                pl.BlockSpec((tm, N), lambda i: (i, 0)),          # gcn_adj row tile
                pl.BlockSpec((in_f, F_pad), lambda i: (0, 0)),    # Wt (padded)
                pl.BlockSpec((label_f, L_pad), lambda i: (0, 0)),  # Wg (padded)
                pl.BlockSpec((L_pad, 1), lambda i: (0, 0)),       # Wtr @ a1^T
                pl.BlockSpec((1, in_f), lambda i: (0, 0)),        # (Wt @ a2^T)^T
            ],
            out_specs=[
                pl.BlockSpec((tm, F_pad), lambda i: (i, 0)),
                pl.BlockSpec((tm, L_pad), lambda i: (i, 0)),
            ],
        ),
        compiler_params=pltpu.CompilerParams(
            dimension_semantics=("parallel",),   # megacore-shard row blocks (v7x)
            vmem_limit_bytes=vmem_limit,
        ),
    )(x.astype(f32), adj.astype(f32), y.astype(f32), gcn_adj.astype(f32),
      wt_p, wg_p, wa1, wa2t)

    return xo_p[:, :out_f], yo_p[:, :label_out_f]


def init_params(key, in_f, out_f, label_f, label_out_f):
    k = jax.random.split(key, 4)
    # deterministic synthetic weights (Linear layers, bias=False), stored
    # pre-transposed as (in_features, out_features)
    wt = jax.random.normal(k[0], (in_f, out_f), jnp.float32) * 0.1            # transformation
    wg = jax.random.normal(k[1], (label_f, label_out_f), jnp.float32) * 0.1   # W (GraphConvolution)
    wtr = jax.random.normal(k[2], (label_out_f, out_f), jnp.float32) * 0.1    # trans
    # a : (1, 2*out_f) with xavier_normal_ init (std = sqrt(2 / (fan_in + fan_out)))
    std = (2.0 / (1 + 2 * out_f)) ** 0.5
    a = jax.random.normal(k[3], (1, 2 * out_f), jnp.float32) * std
    a1 = a[:, :out_f]   # applied to trans(y)[edge[0]]
    a2 = a[:, out_f:]   # applied to x[edge[1]]
    return dict(wt=wt, wg=wg, wtr=wtr, a1=a1, a2=a2)


def reference(x, adj, y, gcn_adj, params):
    # pure-JAX reference of the dense-masked formulation (full f32 matmuls)
    hi = lax.Precision.HIGHEST
    dot = functools.partial(jnp.dot, precision=hi)
    y_out = dot(gcn_adj, dot(y, params["wg"]))
    xt = dot(x, params["wt"])
    ty = dot(y_out, params["wtr"])
    s1 = jnp.sum(ty * params["a1"], axis=1, keepdims=True)     # (N, 1)
    s2 = dot(params["a2"], xt.T)                               # (1, N)
    h = jnp.exp(jnp.tanh(s1 + s2)) * (adj != 0)
    rowsum = h.sum(axis=1, keepdims=True)
    return dot(h, xt) / rowsum, y_out


if __name__ == "__main__":
    N, in_f, out_f, label_f, label_out_f = 128, 32, 32, 16, 16

    key = jax.random.PRNGKey(0)
    kx, ka, ky, kg, kp = jax.random.split(key, 5)

    x = jax.random.normal(kx, (N, in_f), jnp.float32)
    # random sparse adjacency with guaranteed self-loops (rowsum > 0, no NaNs)
    adj = (jax.random.uniform(ka, (N, N)) < 0.3).astype(jnp.float32)
    adj = jnp.maximum(adj, jnp.eye(N, dtype=jnp.float32))
    y = jax.random.normal(ky, (N, label_f), jnp.float32)
    gcn_adj = (jax.random.uniform(kg, (N, N)) < 0.3).astype(jnp.float32)

    params = init_params(kp, in_f, out_f, label_f, label_out_f)

    # row_tile=32 -> grid=(4,) so the pipelined/tiled path is exercised.
    x_out, y_out = sp_attention_forward(x, adj, y, gcn_adj, params, row_tile=32)
    jax.block_until_ready((x_out, y_out))

    x_ref, y_ref = reference(x, adj, y, gcn_adj, params)
    np.testing.assert_allclose(np.asarray(x_out), np.asarray(x_ref), rtol=1e-4, atol=1e-4)
    np.testing.assert_allclose(np.asarray(y_out), np.asarray(y_ref), rtol=1e-4, atol=1e-4)

    print("KERNEL_OK")
</pallas_src>

<mosaic_0001>
module attributes {stable_mosaic.version = 11 : i64} {
  func.func @sp_attention_kernel(%arg0: i32, %arg1: memref<128x32xf32, #tpu.memory_space<vmem>>, %arg2: memref<32x128xf32, #tpu.memory_space<vmem>>, %arg3: memref<128x16xf32, #tpu.memory_space<vmem>>, %arg4: memref<32x128xf32, #tpu.memory_space<vmem>>, %arg5: memref<32x128xf32, #tpu.memory_space<vmem>>, %arg6: memref<16x128xf32, #tpu.memory_space<vmem>>, %arg7: memref<128x1xf32, #tpu.memory_space<vmem>>, %arg8: memref<1x32xf32, #tpu.memory_space<vmem>>, %arg9: memref<32x128xf32, #tpu.memory_space<vmem>>, %arg10: memref<32x128xf32, #tpu.memory_space<vmem>>) attributes {dimension_semantics = [#tpu.dimension_semantics<parallel>], iteration_bounds = array<i64: 4>, scalar_prefetch = 0 : i64, scratch_operands = 0 : i64, tpu.core_type = #tpu.core_type<tc>, window_params = [{pipeline_mode = #tpu.pipeline_mode<synchronous>, transform_indices = @transform_0, window_bounds = array<i64: 128, 32>}, {transform_indices = @transform_1, window_bounds = array<i64: 32, 128>}, {pipeline_mode = #tpu.pipeline_mode<synchronous>, transform_indices = @transform_2, window_bounds = array<i64: 128, 16>}, {transform_indices = @transform_3, window_bounds = array<i64: 32, 128>}, {pipeline_mode = #tpu.pipeline_mode<synchronous>, transform_indices = @transform_4, window_bounds = array<i64: 32, 128>}, {pipeline_mode = #tpu.pipeline_mode<synchronous>, transform_indices = @transform_5, window_bounds = array<i64: 16, 128>}, {pipeline_mode = #tpu.pipeline_mode<synchronous>, transform_indices = @transform_6, window_bounds = array<i64: 128, 1>}, {pipeline_mode = #tpu.pipeline_mode<synchronous>, transform_indices = @transform_7, window_bounds = array<i64: 1, 32>}, {transform_indices = @transform_8, window_bounds = array<i64: 32, 128>}, {transform_indices = @transform_9, window_bounds = array<i64: 32, 128>}]} {
    %c0 = arith.constant 0 : index
    %c0_0 = arith.constant 0 : index
    %0 = vector.load %arg3[%c0, %c0_0] : memref<128x16xf32, #tpu.memory_space<vmem>>, vector<128x16xf32>
    %c0_1 = arith.constant 0 : index
    %c0_2 = arith.constant 0 : index
    %1 = vector.load %arg6[%c0_1, %c0_2] : memref<16x128xf32, #tpu.memory_space<vmem>>, vector<16x128xf32>
    %cst = arith.constant dense<0.000000e+00> : vector<128x128xf32>
    %2 = tpu.matmul %0, %1, %cst {dimension_numbers = #tpu.dot_dimension_numbers<[1], [0], [0], [1], [0, 0, 1, 1], [], []>} : vector<128x16xf32>, vector<16x128xf32>, vector<128x128xf32> -> vector<128x128xf32>
    %c0_3 = arith.constant 0 : index
    %c0_4 = arith.constant 0 : index
    %3 = vector.load %arg4[%c0_3, %c0_4] : memref<32x128xf32, #tpu.memory_space<vmem>>, vector<32x128xf32>
    %cst_5 = arith.constant dense<0.000000e+00> : vector<32x128xf32>
    %4 = tpu.matmul %3, %2, %cst_5 {dimension_numbers = #tpu.dot_dimension_numbers<[1], [0], [0], [1], [0, 0, 1, 1], [], []>} : vector<32x128xf32>, vector<128x128xf32>, vector<32x128xf32> -> vector<32x128xf32>
    %c0_6 = arith.constant 0 : index
    %c0_7 = arith.constant 0 : index
    %5 = vector.load %arg10[%c0_6, %c0_7] : memref<32x128xf32, #tpu.memory_space<vmem>>, vector<32x128xf32>
    tpu.vector_store %arg10[%c0_6, %c0_7], %4 {strides = array<i32>} : memref<32x128xf32, #tpu.memory_space<vmem>>, vector<32x128xf32>,
    %c0_8 = arith.constant 0 : index
    %c0_9 = arith.constant 0 : index
    %6 = vector.load %arg1[%c0_8, %c0_9] : memref<128x32xf32, #tpu.memory_space<vmem>>, vector<128x32xf32>
    %c0_10 = arith.constant 0 : index
    %c0_11 = arith.constant 0 : index
    %7 = vector.load %arg5[%c0_10, %c0_11] : memref<32x128xf32, #tpu.memory_space<vmem>>, vector<32x128xf32>
    %cst_12 = arith.constant dense<0.000000e+00> : vector<128x128xf32>
    %8 = tpu.matmul %6, %7, %cst_12 {dimension_numbers = #tpu.dot_dimension_numbers<[1], [0], [0], [1], [0, 0, 1, 1], [], []>} : vector<128x32xf32>, vector<32x128xf32>, vector<128x128xf32> -> vector<128x128xf32>
    %c0_13 = arith.constant 0 : index
    %c0_14 = arith.constant 0 : index
    %9 = vector.load %arg7[%c0_13, %c0_14] : memref<128x1xf32, #tpu.memory_space<vmem>>, vector<128x1xf32>
    %cst_15 = arith.constant dense<0.000000e+00> : vector<32x1xf32>
    %10 = tpu.matmul %4, %9, %cst_15 {dimension_numbers = #tpu.dot_dimension_numbers<[1], [0], [0], [1], [0, 0, 1, 1], [], []>} : vector<32x128xf32>, vector<128x1xf32>, vector<32x1xf32> -> vector<32x1xf32>
    %c0_16 = arith.constant 0 : index
    %c0_17 = arith.constant 0 : index
    %11 = vector.load %arg8[%c0_16, %c0_17] : memref<1x32xf32, #tpu.memory_space<vmem>>, vector<1x32xf32>
    %c0_18 = arith.constant 0 : index
    %c0_19 = arith.constant 0 : index
    %12 = vector.load %arg1[%c0_18, %c0_19] : memref<128x32xf32, #tpu.memory_space<vmem>>, vector<128x32xf32>
    %cst_20 = arith.constant dense<0.000000e+00> : vector<1x128xf32>
    %13 = tpu.matmul %11, %12, %cst_20 {dimension_numbers = #tpu.dot_dimension_numbers<[1], [1], [0], [0], [0, 0, 1, 0], [], []>} : vector<1x32xf32>, vector<128x32xf32>, vector<1x128xf32> -> vector<1x128xf32>
    %14 = vector.broadcast %10 : vector<32x1xf32> to vector<32x128xf32>
    %15 = vector.broadcast %13 : vector<1x128xf32> to vector<32x128xf32>
    %16 = arith.addf %14, %15 : vector<32x128xf32>
    %c0_21 = arith.constant 0 : index
    %c0_22 = arith.constant 0 : index
    %17 = vector.load %arg2[%c0_21, %c0_22] : memref<32x128xf32, #tpu.memory_space<vmem>>, vector<32x128xf32>
    %cst_23 = arith.constant 0.000000e+00 : f32
    %18 = vector.broadcast %cst_23 : f32 to vector<32x128xf32>
    %19 = arith.cmpf one, %17, %18 : vector<32x128xf32>
    %20 = math.tanh %16 : vector<32x128xf32>
    %21 = math.exp %20 : vector<32x128xf32>
    %cst_24 = arith.constant 0.000000e+00 : f32
    %22 = vector.broadcast %cst_24 : f32 to vector<32x128xf32>
    %23 = arith.select %19, %21, %22 : vector<32x128xi1>, vector<32x128xf32>
    %24 = tpu.iota {dimensions = array<i32: 1>} : vector<128x128xi32>
    %c32_i32 = arith.constant 32 : i32
    %25 = vector.broadcast %c32_i32 : i32 to vector<128x128xi32>
    %26 = arith.cmpi eq, %24, %25 : vector<128x128xi32>
    %cst_25 = arith.constant 1.000000e+00 : f32
    %27 = vector.broadcast %cst_25 : f32 to vector<128x128xf32>
    %28 = arith.select %26, %27, %8 : vector<128x128xi1>, vector<128x128xf32>
    %cst_26 = arith.constant dense<0.000000e+00> : vector<32x128xf32>
    %29 = tpu.matmul %23, %28, %cst_26 {dimension_numbers = #tpu.dot_dimension_numbers<[1], [0], [0], [1], [0, 0, 1, 1], [], []>} : vector<32x128xf32>, vector<128x128xf32>, vector<32x128xf32> -> vector<32x128xf32>
    %30 = vector.extract_strided_slice %29 {offsets = [0, 32], sizes = [32, 1], strides = [1, 1]} : vector<32x128xf32> to vector<32x1xf32>
    %31 = vector.broadcast %30 : vector<32x1xf32> to vector<32x128xf32>
    %32 = arith.divf %29, %31 : vector<32x128xf32>
    %c0_27 = arith.constant 0 : index
    %c0_28 = arith.constant 0 : index
    %33 = vector.load %arg9[%c0_27, %c0_28] : memref<32x128xf32, #tpu.memory_space<vmem>>, vector<32x128xf32>
    tpu.vector_store %arg9[%c0_27, %c0_28], %32 {strides = array<i32>} : memref<32x128xf32, #tpu.memory_space<vmem>>, vector<32x128xf32>,
    return
  }
  func.func @transform_0(%arg0: i32) -> (i32, i32) {
    %c0_i32 = arith.constant 0 : i32
    %c0_i32_0 = arith.constant 0 : i32
    %c0_i32_1 = arith.constant 0 : i32
    return %c0_i32, %c0_i32_0 : i32, i32
  }
  func.func @transform_1(%arg0: i32) -> (i32, i32) {
    %c0_i32 = arith.constant 0 : i32
    %c0_i32_0 = arith.constant 0 : i32
    return %arg0, %c0_i32 : i32, i32
  }
  func.func @transform_2(%arg0: i32) -> (i32, i32) {
    %c0_i32 = arith.constant 0 : i32
    %c0_i32_0 = arith.constant 0 : i32
    %c0_i32_1 = arith.constant 0 : i32
    return %c0_i32, %c0_i32_0 : i32, i32
  }
  func.func @transform_3(%arg0: i32) -> (i32, i32) {
    %c0_i32 = arith.constant 0 : i32
    %c0_i32_0 = arith.constant 0 : i32
    return %arg0, %c0_i32 : i32, i32
  }
  func.func @transform_4(%arg0: i32) -> (i32, i32) {
    %c0_i32 = arith.constant 0 : i32
    %c0_i32_0 = arith.constant 0 : i32
    %c0_i32_1 = arith.constant 0 : i32
    return %c0_i32, %c0_i32_0 : i32, i32
  }
  func.func @transform_5(%arg0: i32) -> (i32, i32) {
    %c0_i32 = arith.constant 0 : i32
    %c0_i32_0 = arith.constant 0 : i32
    %c0_i32_1 = arith.constant 0 : i32
    return %c0_i32, %c0_i32_0 : i32, i32
  }
  func.func @transform_6(%arg0: i32) -> (i32, i32) {
    %c0_i32 = arith.constant 0 : i32
    %c0_i32_0 = arith.constant 0 : i32
    %c0_i32_1 = arith.constant 0 : i32
    return %c0_i32, %c0_i32_0 : i32, i32
  }
  func.func @transform_7(%arg0: i32) -> (i32, i32) {
    %c0_i32 = arith.constant 0 : i32
    %c0_i32_0 = arith.constant 0 : i32
    %c0_i32_1 = arith.constant 0 : i32
    return %c0_i32, %c0_i32_0 : i32, i32
  }
  func.func @transform_8(%arg0: i32) -> (i32, i32) {
    %c0_i32 = arith.constant 0 : i32
    %c0_i32_0 = arith.constant 0 : i32
    return %arg0, %c0_i32 : i32, i32
  }
  func.func @transform_9(%arg0: i32) -> (i32, i32) {
    %c0_i32 = arith.constant 0 : i32
    %c0_i32_0 = arith.constant 0 : i32
    return %arg0, %c0_i32 : i32, i32
  }
}

</mosaic_0001>

<bundles_post_ra>
// kernel: tpu_custom_call.1
= control target key start
LH: loop header
LB: loop body
LE: loop exit
PB: predicated region body
PF: predicated region fallthrough
CT: control target
= control target key end

     0   :  { %s1797_s0 = inlined_call_operand.vmem [shape: f32[128,32], index: 0, kind: input, shape index: {}]   ;;  %s1798_s1 = inlined_call_operand.vmem [shape: f32[128,128], index: 1, kind: input, shape index: {}]   ;;  %s1799_s2 = inlined_call_operand.vmem [shape: f32[128,16], index: 2, kind: input, shape index: {}]   ;;  %s1800_s3 = inlined_call_operand.vmem [shape: f32[128,128], index: 3, kind: input, shape index: {}]   ;;  %s1801_s4 = inlined_call_operand.vmem [shape: f32[32,128], index: 4, kind: input, shape index: {}]   ;;  %s1802_s5 = inlined_call_operand.vmem [shape: f32[16,128], index: 5, kind: input, shape index: {}]   ;;  %s1803_s6 = inlined_call_operand.vmem [shape: f32[128,1], index: 6, kind: input, shape index: {}]   ;;  %s1804_s7 = inlined_call_operand.vmem [shape: f32[1,32], index: 7, kind: input, shape index: {}]   ;;  %s1805_s8 = inlined_call_operand.hbm [shape: f32[128,128], index: 8, kind: output, shape index: {0}]   ;;  %s1806_s9 = inlined_call_operand.hbm [shape: f32[128,128], index: 9, kind: output, shape index: {1}]  }
   0x1   :  { %1808 = sst [smem:[#allocation8_spill]] %s1797_s0 }
   0x2   :  { %1809 = sst [smem:[#allocation9_spill]] %s1798_s1 }
   0x3   :  { %1810 = sst [smem:[#allocation10_spill]] %s1799_s2 }
   0x4   :  { %15 = vsyncpa [#allocation3], 0 }
   0x5   :  { %17 = vsyncpa [#allocation3 + $0x1], 0 }
   0x6   :  { %18 = vsyncpa [#allocation5], 0 }
   0x7   :  { %20 = vsyncpa [#allocation5 + $0x1], 0  ;;  %s1366_s30 = smov 0   ;;  %s1368_s10 = smov 0  }
   0x8   :  { %s1370_s11 = smov 0   ;;  %s1372_s12 = smov 0  }
   0x9 LB: > { %s1387_s13 = sadd.s32 4294967295, %s1310_s12   ;;  %s1066_s14 = sadd.s32 4294967294, %s1310_s12   ;;  %s1310_s12 = sphi %s1372_s12, %s1820_s12   ;;  %s1306_s11 = sphi %s1370_s11, %s1819_s11   ;;  %s1302_s10 = sphi %s1368_s10, %s1818_s10   ;;  %s1298_s30 = sphi %s1366_s30, %s1817_s30  }
   0xa   : > { %s1391_s15 = sadd.s32 1, %s1310_s12   ;;  %s211_s16 = sadd.s32 1, %s1306_s11 }
   0xb   : > { %s208_s17 = ssub.s32 %s1310_s12, %s1391_s15  ;;  %p221_p0 = scmp.ne.s32.totalorder %s1306_s11, %s1302_s10 }
   0xc   : > { %p209_p1 = scmp.eq.s32.totalorder %s208_s17, 0  ;;  %p222_p2 = scmp.eq.s32.totalorder %s1387_s13, 3 }
   0xd   : > { %p227_p3 = scmp.ne.s32.totalorder %s1302_s10, %s1298_s30  ;;  %p228_p4 = scmp.eq.s32.totalorder %s1066_s14, 3 }
   0xe   : > { %s1402_s18 = scalar_select %p209_p1, %s1306_s11, %s211_s16  }
   0xf   : > { %p1404_p5 = por %p222_p2, %p221_p0  ;;  %p1408_p6 = por %p228_p4, %p227_p3 }
  0x10   : > { %p1069_p7 = scmp.ge.s32.totalorder %s1310_s12, 1  ;;  %p308_p8 = scmp.lt.s32.totalorder %s1310_s12, 5 }
  0x12   : > { %p309_p9 = pnand %p1069_p7, %p308_p8 }
  0x13   : > { %s1813_s2 = sld [smem:[#allocation10_spill]] (!%p309_p9)  ;;  %s1072_s21 = sshll.u32 (!%p309_p9), %s1387_s13, 2 }
  0x14   : > { %312 = sbr.rel (%p309_p9) target bundleno = 990 (0x3de), region = 52  ;;  %s1814_s0 = sld [smem:[#allocation8_spill]] (!%p309_p9) }
  0x15   : > { %p355_p10 = scmp.lt.s32.totalorder (!%p309_p9), %s1072_s21, 15  ;;  %s1674_s25 = sand.u32 (!%p309_p9), 1, %s1302_s10  }
  0x16   : > { %s1807_s26 = sshll.u32 (!%p309_p9), %s1674_s25, 5  ;;  %s1815_s1 = sld [smem:[#allocation9_spill]] (!%p309_p9) }
  0x17   : > { %s1679_s27 = scalar_lea.vmem (!%p309_p9), [#allocation4], %s1807_s26  ;;  %s927_s14 = scalar_lea.sflag (!%p309_p9), [#allocation5], %s1674_s25 }
  0x19   : > { %v385_v0 = vld [vmem:[%s1802_s5 + $0x8] sm:$0xff]  ;;  %v384_v1 = vld [vmem:[%s1802_s5] sm:$0xff]  ;;  %vm386_vm0 = vcmask 130048   ;;  %v370_v4 = vld [vmem:[%s1813_s2 + $0x10] sm:$0xff]  ;;  %vm557_vm1 = vcmask 261120   ;;  %s1822_s21 = smov (!%p355_p10, %s1072_s21), 15 }
  0x1a   : > { %449 = vmatpush.msra.mxu0 %v385_v0  ;;  %v368_v2 = vld [vmem:[%s1813_s2] sm:$0xff]  ;;  %v369_v3 = vld [vmem:[%s1813_s2 + $0x8] sm:$0xff]  ;;  %v371_v5 = vld [vmem:[%s1813_s2 + $0x18] sm:$0xff]  ;;  %s1073_s24 = sshll.u32 %s1822_s21, 3  ;;  %s956_s21 = sshll.u32 %s1679_s27, 4  ;;  %s957_s21 = int_to_ptr.vmem [resolvable:$true] %s956_s21 }
  0x1b   : > { %v372_v6 = vld [vmem:[%s1813_s2 + $0x20] sm:$0xff]  ;;  %v373_v7 = vld [vmem:[%s1813_s2 + $0x28] sm:$0xff]  ;;  %v374_v8 = vld [vmem:[%s1813_s2 + $0x30] sm:$0xff]  ;;  %s364_s29 = scalar_lea.vmem %s1800_s3, %s1073_s24 }
  0x1c   : > { %450 = vmatpush.msra.mxu0 %v384_v1  ;;  %v375_v9 = vld [vmem:[%s1813_s2 + $0x38] sm:$0xff]  ;;  %v376_v10 = vld [vmem:[%s1813_s2 + $0x40] sm:$0xff]  ;;  %v377_v11 = vld [vmem:[%s1813_s2 + $0x48] sm:$0xff]  ;;  %s1713_s17 = scalar_lea.vmem %s1815_s1, %s1073_s24  ;;  %s1137_s24 = sshll.u32 %s1387_s13, 5 }
  0x1d   : > { %1076 = vmatmul.msk.f32.vlgmr.msra.gmra.mxu0 %vm386_vm0, %v368_v2  ;;  %v378_v12 = vld [vmem:[%s1813_s2 + $0x50] sm:$0xff]  ;;  %v379_v13 = vld [vmem:[%s1813_s2 + $0x58] sm:$0xff]  ;;  %v380_v14 = vld [vmem:[%s1813_s2 + $0x60] sm:$0xff] }
  0x1e   : > { %v381_v15 = vld [vmem:[%s1813_s2 + $0x68] sm:$0xff]  ;;  %v382_v16 = vld [vmem:[%s1813_s2 + $0x70] sm:$0xff]  ;;  %v383_v17 = vld [vmem:[%s1813_s2 + $0x78] sm:$0xff] }
  0x1f   : > { %v556_v27 = vld [vmem:[%s1801_s4 + $0x18] sm:$0xff]  ;;  %v555_v28 = vld [vmem:[%s1801_s4 + $0x10] sm:$0xff]  ;;  %v554_v30 = vld [vmem:[%s1801_s4 + $0x8] sm:$0xff] }
  0x20   : > { %618 = vmatpush.msra.mxu2 %v556_v27  ;;  %v553_v31 = vld [vmem:[%s1801_s4] sm:$0xff]  ;;  %v1510_v34 = vld [vmem:[%s1814_s0 + $0x8] sm:$0xff]  ;;  %v1517_v36 = vld [vmem:[%s1814_s0 + $0x10] sm:$0xff] }
  0x21   : > { %v1503_v32 = vld [vmem:[%s1814_s0] sm:$0xff]  ;;  %v1524_v38 = vld [vmem:[%s1814_s0 + $0x18] sm:$0xff]  ;;  %v1538_v42 = vld [vmem:[%s1814_s0 + $0x28] sm:$0xff] }
  0x22   : > { %619 = vmatpush.msra.mxu2 %v555_v28  ;;  %v1531_v40 = vld [vmem:[%s1814_s0 + $0x20] sm:$0xff]  ;;  %v1545_v44 = vld [vmem:[%s1814_s0 + $0x30] sm:$0xff]  ;;  %v544_v45 = vld [vmem:[%s1814_s0 + $0x38] sm:$0xff]  ;;  %v789_v28 = vlaneseq }
  0x23   : > { %v545_v46 = vld [vmem:[%s1814_s0 + $0x40] sm:$0xff]  ;;  %v546_v47 = vld [vmem:[%s1814_s0 + $0x48] sm:$0xff]  ;;  %v547_v49 = vld [vmem:[%s1814_s0 + $0x50] sm:$0xff] }
  0x24   : > { %620 = vmatpush.msra.mxu2 %v554_v30  ;;  %v500_v48 = vld [vmem:[%s364_s29] sm:$0xff]  ;;  %v552_v50 = vld [vmem:[%s1814_s0 + $0x78] sm:$0xff]  ;;  %v501_v51 = vld [vmem:[%s364_s29 + $0x8] sm:$0xff]  ;;  %v790_v30 = vand.u32 127, %v789_v28 }
  0x25   : > { %1077 = vmatmul.msk.f32.gmra.mxu0 %vm386_vm0, %v369_v3  ;;  %v551_v52 = vld [vmem:[%s1814_s0 + $0x70] sm:$0xff]  ;;  %v548_v53 = vld [vmem:[%s1814_s0 + $0x58] sm:$0xff]  ;;  %v550_v54 = vld [vmem:[%s1814_s0 + $0x68] sm:$0xff] }
  0x26   : > { %621 = vmatpush.msra.mxu2 %v553_v31  ;;  %v502_v55 = vld [vmem:[%s364_s29 + $0x10] sm:$0xff]  ;;  %v549_v56 = vld [vmem:[%s1814_s0 + $0x60] sm:$0xff]  ;;  %v503_v57 = vld [vmem:[%s364_s29 + $0x18] sm:$0xff]  ;;  %vm791_vm2 = vcmp.eq.s32.totalorder %v790_v30, 32  ;;  %s955_s29 = scalar_lea.hbm %s1806_s9, %s1137_s24 }
  0x27   : > { %1092 = vmatmul.msk.f32.vlgmr.msra.gmra.mxu2 %vm557_vm1, %v1503_v32  ;;  %v686_v58 = vld [vmem:[%s1803_s6 + $0x78] sm:$0xff]  ;;  %v685_v59 = vld [vmem:[%s1803_s6 + $0x70] sm:$0xff]  ;;  %v684_v60 = vld [vmem:[%s1803_s6 + $0x68] sm:$0xff]  ;;  %s958_s28 = sshll.u32 %s955_s29, 4  ;;  %s959_s28 = int_to_ptr.hbm [resolvable:$true] %s958_s28 }
  0x28   : > { %687 = vmatpush.msra.mxu3 %v686_v58  ;;  %v683_v61 = vld [vmem:[%s1803_s6 + $0x60] sm:$0xff]  ;;  %v682_v62 = vld [vmem:[%s1803_s6 + $0x58] sm:$0xff]  ;;  %v681_v63 = vld [vmem:[%s1803_s6 + $0x50] sm:$0xff]  ;;  %s1230_s16 = sshra.s32 %s959_s28, 4  ;;  %s1231_s16 = int_to_ptr.hbm [resolvable:$true] %s1230_s16 }
  0x29   : > { %v680_v0 = vld [vmem:[%s1803_s6 + $0x48] sm:$0xff]  ;;  %v679_v1 = vld [vmem:[%s1803_s6 + $0x40] sm:$0xff]  ;;  %v678_v2 = vld [vmem:[%s1803_s6 + $0x38] sm:$0xff]  ;;  %p1237_p0 = scmp.lt.s32.totalorder %s1231_s16, %s1806_s9 }
  0x2a   : > { %688 = vmatpush.msra.mxu3 %v685_v59  ;;  %v677_v3 = vld [vmem:[%s1803_s6 + $0x30] sm:$0xff] }
  0x2c   : > { %689 = vmatpush.msra.mxu3 %v684_v60 }
  0x2d   : > { %1078 = vmatmul.msk.f32.gmra.mxu0 %vm386_vm0, %v370_v4  ;;  %v676_v4 = vld [vmem:[%s1803_s6 + $0x28] sm:$0xff] }
  0x2e   : > { %690 = vmatpush.msra.mxu3 %v683_v61 }
  0x2f   : > { %1093 = vmatmul.msk.f32.gmra.mxu2 %vm557_vm1, %v1510_v34 }
  0x30   : > { %691 = vmatpush.msra.mxu3 %v682_v62  ;;  %v1313_v62 = vmov 32  }
  0x31   : > { %1189 = vset.pattern.permute.xlu2 %v1313_v62 }
  0x32   : > { %692 = vmatpush.msra.mxu3 %v681_v63  ;;  %v765_v63 = vld [vmem:[%s1713_s17] sm:$0xff] }
  0x33   : > { %vm769_vm3 = vcmp.ne.f32.partialorder %v765_v63, 0.0 }
  0x34   : > { %693 = vmatpush.msra.mxu3 %v680_v0 }
  0x35   : > { %1079 = vmatmul.msk.f32.gmra.mxu0 %vm386_vm0, %v371_v5  ;;  %v675_v5 = vld [vmem:[%s1803_s6 + $0x20] sm:$0xff] }
  0x36   : > { %694 = vmatpush.msra.mxu3 %v679_v1 }
  0x37   : > { %1094 = vmatmul.msk.f32.gmra.mxu2 %vm557_vm1, %v1517_v36 }
  0x38   : > { %695 = vmatpush.msra.mxu3 %v678_v2 }
  0x3a   : > { %696 = vmatpush.msra.mxu3 %v677_v3 }
  0x3c   : > { %697 = vmatpush.msra.mxu3 %v676_v4 }
  0x3d   : > { %1080 = vmatmul.msk.f32.gmra.mxu0 %vm386_vm0, %v372_v6 }
  0x3e   : > { %698 = vmatpush.msra.mxu3 %v675_v5  ;;  %v766_v5 = vld [vmem:[%s1713_s17 + $0x8] sm:$0xff] }
  0x3f   : > { %1095 = vmatmul.msk.f32.gmra.mxu2 %vm557_vm1, %v1524_v38  ;;  %vm770_vm4 = vcmp.ne.f32.partialorder %v766_v5, 0.0 }
  0x45   : > { %1081 = vmatmul.msk.f32.gmra.mxu0 %vm386_vm0, %v373_v7  ;;  %v674_v7 = vld [vmem:[%s1803_s6 + $0x18] sm:$0xff] }
  0x46   : > { %699 = vmatpush.msra.mxu3 %v674_v7 }
  0x47   : > { %1096 = vmatmul.msk.f32.gmra.mxu2 %vm557_vm1, %v1531_v40 }
  0x4d   : > { %1082 = vmatmul.msk.f32.gmra.mxu0 %vm386_vm0, %v374_v8  ;;  %v673_v8 = vld [vmem:[%s1803_s6 + $0x10] sm:$0xff] }
  0x4e   : > { %700 = vmatpush.msra.mxu3 %v673_v8 }
  0x4f   : > { %1097 = vmatmul.msk.f32.gmra.mxu2 %vm557_vm1, %v1538_v42 }
  0x55   : > { %1083 = vmatmul.msk.f32.gmra.mxu0 %vm386_vm0, %v375_v9  ;;  %v672_v9 = vld [vmem:[%s1803_s6 + $0x8] sm:$0xff] }
  0x56   : > { %701 = vmatpush.msra.mxu3 %v672_v9 }
  0x57   : > { %1098 = vmatmul.msk.f32.gmra.mxu2 %vm557_vm1, %v1545_v44 }
  0x5d   : > { %1084 = vmatmul.msk.f32.gmra.mxu0 %vm386_vm0, %v376_v10 }
  0x5f   : > { %1099 = vmatmul.msk.f32.gmra.mxu2 %vm557_vm1, %v544_v45 }
  0x65   : > { %1085 = vmatmul.msk.f32.gmra.mxu0 %vm386_vm0, %v377_v11 }
  0x67   : > { %1100 = vmatmul.msk.f32.gmra.mxu2 %vm557_vm1, %v545_v46 }
  0x6d   : > { %1086 = vmatmul.msk.f32.gmra.mxu0 %vm386_vm0, %v378_v12 }
  0x6f   : > { %1101 = vmatmul.msk.f32.gmra.mxu2 %vm557_vm1, %v546_v47 }
  0x75   : > { %1087 = vmatmul.msk.f32.gmra.mxu0 %vm386_vm0, %v379_v13 }
  0x77   : > { %1102 = vmatmul.msk.f32.gmra.mxu2 %vm557_vm1, %v547_v49 }
  0x7d   : > { %1088 = vmatmul.msk.f32.gmra.mxu0 %vm386_vm0, %v380_v14  ;;  %v671_v14 = vld [vmem:[%s1803_s6] sm:$0xff] }
  0x7e   : > { %702 = vmatpush.msra.mxu3 %v671_v14 }
  0x7f   : > { %1103 = vmatmul.msk.f32.gmra.mxu2 %vm557_vm1, %v548_v53 }
  0x85   : > { %1089 = vmatmul.msk.f32.gmra.mxu0 %vm386_vm0, %v381_v15 }
  0x87   : > { %1104 = vmatmul.msk.f32.gmra.mxu2 %vm557_vm1, %v549_v56 }
  0x8d   : > { %1090 = vmatmul.msk.f32.gmra.mxu0 %vm386_vm0, %v382_v16 }
  0x8f   : > { %1105 = vmatmul.msk.f32.gmra.mxu2 %vm557_vm1, %v550_v54 }
  0x95   : > { %1091 = vmatmul.msk.f32.gmra.mxu0 %vm386_vm0, %v383_v17 }
  0x97   : > { %1106 = vmatmul.msk.f32.gmra.mxu2 %vm557_vm1, %v551_v52 }
  0x9a   : > { %v1484_v18 = vpop.f32.mrf.mxu0 }
  0x9f   : > { %1107 = vmatmul.msk.f32.gmra.mxu2 %vm557_vm1, %v552_v50 }
  0xa2   : > { %v1486_v19 = vpop.f32.mrf.mxu0 }
  0xaa   : > { %v458_v20 = vpop.f32.mrf.mxu0  ;;  %v1649_v6 = vpop.f32.mrf.mxu2 }
  0xb2   : > { %v461_v21 = vpop.f32.mrf.mxu0  ;;  %v1664_v10 = vpop.f32.mrf.mxu2 }
  0xba   : > { %v464_v22 = vpop.f32.mrf.mxu0  ;;  %v1668_v11 = vpop.f32.mrf.mxu2 }
  0xc2   : > { %v467_v23 = vpop.f32.mrf.mxu0  ;;  %v632_v12 = vpop.f32.mrf.mxu2 }
  0xca   : > { %v470_v24 = vpop.f32.mrf.mxu0  ;;  %v635_v13 = vpop.f32.mrf.mxu2 }
  0xd2   : > { %v473_v25 = vpop.f32.mrf.mxu0  ;;  %v638_v15 = vpop.f32.mrf.mxu2 }
  0xda   : > { %v476_v26 = vpop.f32.mrf.mxu0  ;;  %v641_v16 = vpop.f32.mrf.mxu2 }
  0xe2   : > { %v479_v29 = vpop.f32.mrf.mxu0  ;;  %v644_v17 = vpop.f32.mrf.mxu2 }
  0xea   : > { %v482_v33 = vpop.f32.mrf.mxu0 }
  0xf2   : > { %v485_v35 = vpop.f32.mrf.mxu0 }
  0xfa   : > { %v488_v37 = vpop.f32.mrf.mxu0 }
 0x102   : > { %v491_v39 = vpop.f32.mrf.mxu0 }
 0x10a   : > { %v494_v41 = vpop.f32.mrf.mxu0 }
 0x112   : > { %v497_v43 = vpop.f32.mrf.mxu0 }
 0x113   : > { %504 = vmatpush.msra.mxu1 %v497_v43  ;;  %v798_v43 = vsel %vm791_vm2, 1.0, %v641_v16 }
 0x115   : > { %505 = vmatpush.msra.mxu1 %v494_v41 }
 0x117   : > { %506 = vmatpush.msra.mxu1 %v491_v39 }
 0x119   : > { %507 = vmatpush.msra.mxu1 %v488_v37 }
 0x11b   : > { %508 = vmatpush.msra.mxu1 %v485_v35  ;;  %v1312_v35 = vmov 0  }
 0x11c   : > { %1187 = vset.pattern.permute.xlu0 %v1312_v35  ;;  %1188 = vset.pattern.permute.xlu1 %v1312_v35 }
 0x11d   : > { %509 = vmatpush.msra.mxu1 %v482_v33 }
 0x11f   : > { %510 = vmatpush.msra.mxu1 %v479_v29 }
 0x121   : > { %511 = vmatpush.msra.mxu1 %v476_v26 }
 0x123   : > { %512 = vmatpush.msra.mxu1 %v473_v25 }
 0x125   : > { %513 = vmatpush.msra.mxu1 %v470_v24 }
 0x127   : > { %514 = vmatpush.msra.mxu1 %v467_v23 }
 0x129   : > { %515 = vmatpush.msra.mxu1 %v464_v22 }
 0x12b   : > { %516 = vmatpush.msra.mxu1 %v461_v21 }
 0x12d   : > { %517 = vmatpush.msra.mxu1 %v458_v20 }
 0x12f   : > { %518 = vmatpush.msra.mxu1 %v1486_v19 }
 0x131   : > { %519 = vmatpush.msra.mxu1 %v1484_v18  ;;  %v647_v18 = vpop.f32.mrf.mxu2 }
 0x132   : > { %520 = vmatmul.f32.vlgmr.msra.gmra.mxu1 %v500_v48  ;;  %v800_v41 = vsel %vm791_vm2, 1.0, %v647_v18  ;;  %v793_v48 = vsel %vm791_vm2, 1.0, %v1664_v10 }
 0x133   : > { %1108 = vmatpush.xpose.msk.msrb.mxu1 %vm557_vm1, %v552_v50 }
 0x137   : > { %1109 = vmatpush.xpose.msk.msrb.mxu1 %vm557_vm1, %v551_v52 }
 0x139   : > { %v650_v20 = vpop.f32.mrf.mxu2 }
 0x13a   : > { %523 = vmatmul.f32.gmra.mxu1 %v501_v51 }
 0x13b   : > { %1110 = vmatpush.xpose.msk.msrb.mxu1 %vm557_vm1, %v550_v54 }
 0x13f   : > { %1111 = vmatpush.xpose.msk.msrb.mxu1 %vm557_vm1, %v549_v56 }
 0x141   : > { %v653_v22 = vpop.f32.mrf.mxu2 }
 0x142   : > { %526 = vmatmul.f32.gmra.mxu1 %v502_v55  ;;  %v802_v39 = vsel %vm791_vm2, 1.0, %v653_v22 }
 0x143   : > { %1112 = vmatpush.xpose.msk.msrb.mxu1 %vm557_vm1, %v548_v53 }
 0x147   : > { %1113 = vmatpush.xpose.msk.msrb.mxu1 %vm557_vm1, %v547_v49  ;;  %v792_v49 = vsel %vm791_vm2, 1.0, %v1649_v6 }
 0x149   : > { %v656_v24 = vpop.f32.mrf.mxu2 }
 0x14a   : > { %529 = vmatmul.f32.gmra.mxu1 %v503_v57 }
 0x14b   : > { %1114 = vmatpush.xpose.msk.msrb.mxu1 %vm557_vm1, %v546_v47  ;;  %v794_v47 = vsel %vm791_vm2, 1.0, %v1668_v11  ;;  %v767_v11 = vld [vmem:[%s1713_s17 + $0x10] sm:$0xff] }
 0x14c   : > { %vm771_vm5 = vcmp.ne.f32.partialorder %v767_v11, 0.0 }
 0x14f   : > { %1115 = vmatpush.xpose.msk.msrb.mxu1 %vm557_vm1, %v545_v46  ;;  %v795_v46 = vsel %vm791_vm2, 1.0, %v632_v12 }
 0x151   : > { %v659_v26 = vpop.f32.mrf.mxu2 }
 0x152   : > { %v804_v37 = vsel %vm791_vm2, 1.0, %v659_v26 }
 0x153   : > { %1116 = vmatpush.xpose.msk.msrb.mxu1 %vm557_vm1, %v544_v45  ;;  %v796_v45 = vsel %vm791_vm2, 1.0, %v635_v13 }
 0x157   : > { %1117 = vmatpush.xpose.msk.msrb.mxu1 %vm557_vm1, %v1545_v44  ;;  %v797_v44 = vsel %vm791_vm2, 1.0, %v638_v15  ;;  %v768_v15 = vld [vmem:[%s1713_s17 + $0x18] sm:$0xff]  ;;  %s1232_s17 = scalar_lea.hbm %s1231_s16, 32 }
 0x158   : > { %vm772_vm6 = vcmp.ne.f32.partialorder %v768_v15, 0.0  ;;  %p1233_p11 = scmp.ne.s32.totalorder %s1231_s16, %s1232_s17 }
 0x159   : > { %v662_v27 = vpop.f32.mrf.mxu2 }
 0x15a   : > { %p1234_p12 = pnand %p1233_p11, %p1404_p5 }
 0x15b   : > { %1118 = vmatpush.xpose.msk.msrb.mxu1 %vm557_vm1, %v1538_v42  ;;  %v799_v42 = vsel %vm791_vm2, 1.0, %v644_v17 }
 0x15c   : > { %p1235_p13 = pneg %p1234_p12 }
 0x15f   : > { %1119 = vmatpush.xpose.msk.msrb.mxu1 %vm557_vm1, %v1531_v40  ;;  %v801_v40 = vsel %vm791_vm2, 1.0, %v650_v20 }
 0x161   : > { %v665_v29 = vpop.f32.mrf.mxu2 }
 0x163   : > { %1120 = vmatpush.xpose.msk.msrb.mxu1 %vm557_vm1, %v1524_v38  ;;  %v803_v38 = vsel %vm791_vm2, 1.0, %v656_v24 }
 0x167   : > { %1121 = vmatpush.xpose.msk.msrb.mxu1 %vm557_vm1, %v1517_v36  ;;  %v805_v36 = vsel %vm791_vm2, 1.0, %v662_v27 }
 0x169   : > { %v668_v31 = vpop.f32.mrf.mxu2 }
 0x16a   : > { %v807_v33 = vsel %vm791_vm2, 1.0, %v668_v31 }
 0x16b   : > { %1122 = vmatpush.xpose.msk.msrb.mxu1 %vm557_vm1, %v1510_v34  ;;  %v806_v34 = vsel %vm791_vm2, 1.0, %v665_v29  ;;  %808 = vmatpush.msrb.mxu3 %v807_v33 }
 0x16d   : > { %809 = vmatpush.msrb.mxu3 %v806_v34 }
 0x16f   : > { %1123 = vmatpush.xpose.msk.msrb.mxu1 %vm557_vm1, %v1503_v32  ;;  %v716_v32 = vld [vmem:[%s1804_s7] sm:$0x1]  ;;  %810 = vmatpush.msrb.mxu3 %v805_v36 }
 0x171   : > { %811 = vmatpush.msrb.mxu3 %v804_v37 }
 0x172   : > { %1124 = vmatmul.msk.f32.vlgmr.msrb.gmra.mxu1 %vm557_vm1, %v716_v32 }
 0x173   : > { %812 = vmatpush.msrb.mxu3 %v803_v38 }
 0x175   : > { %813 = vmatpush.msrb.mxu3 %v802_v39 }
 0x177   : > { %814 = vmatpush.msrb.mxu3 %v801_v40 }
 0x179   : > { %815 = vmatpush.msrb.mxu3 %v800_v41 }
 0x17b   : > { %816 = vmatpush.msrb.mxu3 %v799_v42 }
 0x17d   : > { %817 = vmatpush.msrb.mxu3 %v798_v43 }
 0x17f   : > { %818 = vmatpush.msrb.mxu3 %v797_v44 }
 0x181   : > { %819 = vmatpush.msrb.mxu3 %v796_v45 }
 0x183   : > { %820 = vmatpush.msrb.mxu3 %v795_v46 }
 0x185   : > { %821 = vmatpush.msrb.mxu3 %v794_v47 }
 0x187   : > { %822 = vmatpush.msrb.mxu3 %v793_v48 }
 0x189   : > { %823 = vmatpush.msrb.mxu3 %v792_v49 }
 0x1af   : > { %v521_v19 = vpop.f32.mrf.mxu1 }
 0x1b0   : > { %533 = vst [vmem:[%s1679_s27] sm:$0xff] %v521_v19  ;;  %703 = vmatmul.f32.vlgmr.msra.gmra.mxu3 %v521_v19 }
 0x1b7   : > { %v524_v21 = vpop.f32.mrf.mxu1 }
 0x1b8   : > { %534 = vst [vmem:[%s1679_s27 + $0x8] sm:$0xff] %v524_v21  ;;  %706 = vmatmul.f32.gmra.mxu3 %v524_v21 }
 0x1bf   : > { %v527_v23 = vpop.f32.mrf.mxu1 }
 0x1c0   : > { %535 = vst [vmem:[%s1679_s27 + $0x10] sm:$0xff] %v527_v23  ;;  %709 = vmatmul.f32.gmra.mxu3 %v527_v23 }
 0x1c7   : > { %v530_v25 = vpop.f32.mrf.mxu1 }
 0x1c8   : > { %536 = vst [vmem:[%s1679_s27 + $0x18] sm:$0xff] %v530_v25  ;;  %712 = vmatmul.f32.gmra.mxu3 %v530_v25  ;;  %s1236_s27 = scalar_lea.hbm %s1806_s9, 128 }
 0x1c9   : > { %p1238_p1 = scmp.lt.s32.totalorder %s1236_s27, %s1232_s17 }
 0x1cb   : > { %p1239_p2 = por %p1238_p1, %p1237_p0 }
 0x1cd   : > { %p1240_p3 = pnand %p1239_p2, %p1235_p13 }
 0x1ef   : > { %v737_v54 = vpop.f32.mrf.mxu1 }
 0x1f0   : > { %v760_v55 = vperm.slane %v737_v54, 0 }
 0x233   : > { %v704_v50 = vpop.f32.mrf.mxu3 }
 0x234   : > { %742 = vperm.xlu0 %1187, %v704_v50  }
 0x23b   : > { %v707_v51 = vpop.f32.mrf.mxu3 }
 0x23c   : > { %747 = vperm.xlu0 %1187, %v707_v51  }
 0x243   : > { %v710_v52 = vpop.f32.mrf.mxu3 }
 0x244   : > { %752 = vperm.xlu1 %1188, %v710_v52   ;;  %1190 = vset.pattern.permute.xlu0 %v1313_v62 }
 0x24b   : > { %v713_v53 = vpop.f32.mrf.mxu3 }
 0x24c   : > { %757 = vperm.xlu1 %1188, %v713_v53  }
 0x254   : > { %1191 = vset.pattern.permute.xlu1 %v1313_v62 }
 0x2a6   : > { %v743_v56 = vpop.permute.xlu0 %742 }
 0x2a7   : > { %v761_v57 = vadd.f32 %v760_v55, %v743_v56 }
 0x2a9   : > { %1192 = vtanh.f32 %v761_v57 }
 0x2ae   : > { %v748_v58 = vpop.permute.xlu0 %747 }
 0x2af   : > { %v1193_v59 = vpop.eup %1192  ;;  %v762_v60 = vadd.f32 %v760_v55, %v748_v58 }
 0x2b0   : > { %v777_v61 = vmul.f32 1.442695, %v1193_v59 }
 0x2b1   : > { %1194 = vtanh.f32 %v762_v60 }
 0x2b2   : > { %1196 = vpow2.f32 %v777_v61 }
 0x2b6   : > { %v753_v0 = vpop.permute.xlu1 %752 }
 0x2b7   : > { %v1195_v1 = vpop.eup %1194  ;;  %v763_v2 = vadd.f32 %v760_v55, %v753_v0 }
 0x2b8   : > { %v1197_v3 = vpop.eup %1196  ;;  %v779_v4 = vmul.f32 1.442695, %v1195_v1 }
 0x2b9   : > { %1198 = vtanh.f32 %v763_v2  ;;  %1125 = vmatmul.msk.f32.vlgmr.msrb.gmra.mxu3 %vm769_vm3, %v1197_v3 }
 0x2ba   : > { %1200 = vpow2.f32 %v779_v4 }
 0x2be   : > { %v758_v6 = vpop.permute.xlu1 %757 }
 0x2bf   : > { %v1199_v7 = vpop.eup %1198  ;;  %v764_v8 = vadd.f32 %v760_v55, %v758_v6 }
 0x2c0   : > { %v1201_v9 = vpop.eup %1200  ;;  %v781_v10 = vmul.f32 1.442695, %v1199_v7 }
 0x2c1   : > { %1202 = vtanh.f32 %v764_v8  ;;  %1126 = vmatmul.msk.f32.gmra.mxu3 %vm770_vm4, %v1201_v9 }
 0x2c2   : > { %1204 = vpow2.f32 %v781_v10 }
 0x2c7   : > { %v1203_v12 = vpop.eup %1202 }
 0x2c8   : > { %v1205_v13 = vpop.eup %1204  ;;  %v783_v14 = vmul.f32 1.442695, %v1203_v12 }
 0x2c9   : > { %1127 = vmatmul.msk.f32.gmra.mxu3 %vm771_vm5, %v1205_v13 }
 0x2ca   : > { %1206 = vpow2.f32 %v783_v14 }
 0x2d0   : > { %v1207_v16 = vpop.eup %1206 }
 0x2d1   : > { %1128 = vmatmul.msk.f32.gmra.mxu3 %vm772_vm6, %v1207_v16 }
 0x33c   : > { %v825_v17 = vpop.f32.mrf.mxu3 }
 0x33d   : > { %839 = vperm.xlu2 %1189, %v825_v17  }
 0x344   : > { %v1719_v18 = vpop.f32.mrf.mxu3 }
 0x345   : > { %844 = vperm.xlu2 %1189, %v1719_v18  }
 0x34c   : > { %v1722_v19 = vpop.f32.mrf.mxu3 }
 0x34d   : > { %849 = vperm.xlu0 %1190, %v1722_v19  }
 0x354   : > { %v1725_v20 = vpop.f32.mrf.mxu3 }
 0x355   : > { %854 = vperm.xlu1 %1191, %v1725_v20  }
 0x356   : > { %1243 = shalt.err (!%p1240_p3)
}
 0x357   : > { %s1314_s22 = smov 128   ;;  %s1315_s23 = smov 8  }
 0x358   : > { %1140 = dma.vmem_to_hbm [thread:$0]  (%p1404_p5), %s957_s21, 512, %s959_s28, %s927_s14, %s1314_s22, %s1314_s22, %s1315_s23  }
 0x359   : > { %s1816_s0 = sshll.u32 %s1674_s25, 5  ;;  %s938_s21 = scalar_lea.hbm %s1805_s8, %s1137_s24 }
 0x35a   : > { %s1751_s1 = scalar_lea.vmem [#allocation2], %s1816_s0  ;;  %s941_s28 = sshll.u32 %s938_s21, 4  ;;  %s942_s28 = int_to_ptr.hbm [resolvable:$true] %s941_s28 }
 0x35b   : > { %s939_s29 = sshll.u32 %s1751_s1, 4  ;;  %s922_s13 = scalar_lea.sflag [#allocation3], %s1674_s25  ;;  %s940_s29 = int_to_ptr.vmem [resolvable:$true] %s939_s29 }
 0x35c   : > { %s1258_s14 = sshra.s32 %s942_s28, 4  ;;  %s1264_s27 = scalar_lea.hbm %s1805_s8, 128  ;;  %s1259_s14 = int_to_ptr.hbm [resolvable:$true] %s1258_s14 }
 0x35d   : > { %s1260_s16 = scalar_lea.hbm %s1259_s14, 32  ;;  %p1265_p9 = scmp.lt.s32.totalorder %s1259_s14, %s1805_s8 }
 0x35e   : > { %p1261_p4 = scmp.ne.s32.totalorder %s1259_s14, %s1260_s16  ;;  %p1266_p10 = scmp.lt.s32.totalorder %s1264_s27, %s1260_s16 }
 0x360   : > { %p1262_p7 = pnand %p1261_p4, %p1404_p5  ;;  %p1267_p11 = por %p1266_p10, %p1265_p9 }
 0x362   : > { %p1263_p8 = pneg %p1262_p7 }
 0x364   : > { %p1268_p12 = pnand %p1267_p11, %p1263_p8 }
 0x397   : > { %v840_v21 = vpop.permute.xlu2 %839 }
 0x398   : > { %1208 = vrcp.f32 %v840_v21  ;;  %v868_v26 = vand.u32 2147483648, %v840_v21  ;;  %v866_v28 = vand.u32 2147483647, %v840_v21  ;;  %vm862_vm8 = vweird.f32 %v840_v21 }
 0x39a   : > { %v869_v31 = vor.u32 1.1754944e-38, %v868_v26  ;;  %vm867_vm10 = vcmp.eq.f32.partialorder %v866_v28, 8.507059e+37 }
 0x39e   : > { %v1209_v22 = vpop.eup %1208 }
 0x39f   : > { %v858_v23 = vmul.f32 %v1209_v22, %v840_v21  ;;  %v845_v24 = vpop.permute.xlu2 %844  ;;  %vm863_vm7 = vweird.f32 %v1209_v22 }
 0x3a0   : > { %1210 = vrcp.f32 %v845_v24  ;;  %vm864_vm9 = vmor %vm862_vm8, %vm863_vm7  ;;  %v883_v37 = vand.u32 2147483648, %v845_v24  ;;  %v881_v39 = vand.u32 2147483647, %v845_v24  ;;  %vm877_vm12 = vweird.f32 %v845_v24 }
 0x3a1   : > { %v859_v25 = vsub.f32 1.0, %v858_v23 }
 0x3a2   : > { %v884_v41 = vor.u32 1.1754944e-38, %v883_v37  ;;  %vm882_vm14 = vcmp.eq.f32.partialorder %v881_v39, 8.507059e+37 }
 0x3a3   : > { %v860_v27 = vmul.f32 %v1209_v22, %v859_v25 }
 0x3a5   : > { %v861_v29 = vadd.f32 %v1209_v22, %v860_v27 }
 0x3a6   : > { %v1211_v30 = vpop.eup %1210 }
 0x3a7   : > { %v865_v32 = vsel %vm864_vm9, %v1209_v22, %v861_v29  ;;  %v873_v33 = vmul.f32 %v1211_v30, %v845_v24  ;;  %vm878_vm11 = vweird.f32 %v1211_v30 }
 0x3a8   : > { %v870_v34 = vsel %vm867_vm10, %v869_v31, %v865_v32  ;;  %vm879_vm13 = vmor %vm877_vm12, %vm878_vm11 }
 0x3a9   : > { %v871_v35 = vmul.f32 %v870_v34, %v825_v17  ;;  %v874_v36 = vsub.f32 1.0, %v873_v33 }
 0x3ab   : > { %917 = vst [vmem:[%s1751_s1] sm:$0xff] %v871_v35  ;;  %v875_v38 = vmul.f32 %v1211_v30, %v874_v36 }
 0x3ad   : > { %v876_v40 = vadd.f32 %v1211_v30, %v875_v38 }
 0x3af   : > { %v880_v42 = vsel %vm879_vm13, %v1211_v30, %v876_v40 }
 0x3b0   : > { %v885_v43 = vsel %vm882_vm14, %v884_v41, %v880_v42 }
 0x3b1   : > { %v886_v44 = vmul.f32 %v885_v43, %v1719_v18 }
 0x3b3   : > { %918 = vst [vmem:[%s1751_s1 + $0x8] sm:$0xff] %v886_v44 }
 0x3bf   : > { %v850_v45 = vpop.permute.xlu0 %849 }
 0x3c0   : > { %1212 = vrcp.f32 %v850_v45  ;;  %v898_v50 = vand.u32 2147483648, %v850_v45  ;;  %v896_v52 = vand.u32 2147483647, %v850_v45  ;;  %vm892_vm0 = vweird.f32 %v850_v45 }
 0x3c2   : > { %v899_v55 = vor.u32 1.1754944e-38, %v898_v50  ;;  %vm897_vm2 = vcmp.eq.f32.partialorder %v896_v52, 8.507059e+37 }
 0x3c6   : > { %v1213_v46 = vpop.eup %1212 }
 0x3c7   : > { %v888_v47 = vmul.f32 %v1213_v46, %v850_v45  ;;  %v855_v48 = vpop.permute.xlu1 %854  ;;  %vm893_vm15 = vweird.f32 %v1213_v46 }
 0x3c8   : > { %1214 = vrcp.f32 %v855_v48  ;;  %vm894_vm1 = vmor %vm892_vm0, %vm893_vm15  ;;  %v913_v61 = vand.u32 2147483648, %v855_v48  ;;  %v911_v63 = vand.u32 2147483647, %v855_v48  ;;  %vm907_vm4 = vweird.f32 %v855_v48 }
 0x3c9   : > { %v889_v49 = vsub.f32 1.0, %v888_v47 }
 0x3ca   : > { %v914_v1 = vor.u32 1.1754944e-38, %v913_v61  ;;  %vm912_vm6 = vcmp.eq.f32.partialorder %v911_v63, 8.507059e+37 }
 0x3cb   : > { %v890_v51 = vmul.f32 %v1213_v46, %v889_v49 }
 0x3cd   : > { %v891_v53 = vadd.f32 %v1213_v46, %v890_v51 }
 0x3ce   : > { %v1215_v54 = vpop.eup %1214 }
 0x3cf   : > { %v895_v56 = vsel %vm894_vm1, %v1213_v46, %v891_v53  ;;  %v903_v57 = vmul.f32 %v1215_v54, %v855_v48  ;;  %vm908_vm3 = vweird.f32 %v1215_v54 }
 0x3d0   : > { %v900_v58 = vsel %vm897_vm2, %v899_v55, %v895_v56  ;;  %vm909_vm5 = vmor %vm907_vm4, %vm908_vm3 }
 0x3d1   : > { %v901_v59 = vmul.f32 %v900_v58, %v1722_v19  ;;  %v904_v60 = vsub.f32 1.0, %v903_v57 }
 0x3d3   : > { %919 = vst [vmem:[%s1751_s1 + $0x10] sm:$0xff] %v901_v59  ;;  %v905_v62 = vmul.f32 %v1215_v54, %v904_v60 }
 0x3d5   : > { %v906_v0 = vadd.f32 %v1215_v54, %v905_v62 }
 0x3d7   : > { %v910_v2 = vsel %vm909_vm5, %v1215_v54, %v906_v0 }
 0x3d8   : > { %v915_v3 = vsel %vm912_vm6, %v914_v1, %v910_v2 }
 0x3d9   : > { %v916_v4 = vmul.f32 %v915_v3, %v1725_v20 }
 0x3db   : > { %920 = vst [vmem:[%s1751_s1 + $0x18] sm:$0xff] %v916_v4 }
 0x3dc   : > { %1271 = shalt.err (!%p1268_p12)
}
 0x3dd   : > { %1139 = dma.vmem_to_hbm [thread:$0]  (%p1404_p5), %s940_s29, 512, %s942_s28, %s922_s13, %s1314_s22, %s1314_s22, %s1315_s23  }
 0x3de PF: > { %p1150_p13 = scmp.ge.s32.totalorder %s1310_s12, 2  ;;  %s973_s25 = sand.u32 1, %s1298_s30  }
 0x3df   : > { %s974_s1 = scalar_lea.sflag [#allocation3], %s973_s25 }
 0x3e0   : > { %p1144_p0 = pnand %p1150_p13, %p1408_p6 }
 0x3e2   : > { %p1145_p1 = pneg %p1144_p0 }
 0x3e4   : > { %1289 = dma.done.wait (%p1145_p1), %s974_s1, 512  }
 0x3e5   : > { %1291 = vsyncadd (%p1145_p1), %s974_s1, 4294966784  ;;  %s984_s26 = scalar_lea.sflag [#allocation5], %s973_s25 }
 0x3e6   : > { %1293 = dma.done.wait (%p1145_p1), %s984_s26, 512  }
 0x3e7   : > { %1295 = vsyncadd (%p1145_p1), %s984_s26, 4294966784  ;;  %p23_p5 = scmp.ge.s32.totalorder %s1391_s15, 6   ;;  %s1817_s30 = smov %s1302_s10 }
 0x3e8   : > { %s1818_s10 = smov %s1306_s11  ;;  %s1819_s11 = smov %s1402_s18 }
 0x3e9   : > { %s1820_s12 = smov %s1391_s15  ;;  %25 = sbr.rel (!%p23_p5) target bundleno = 9 (0x9), region = 107 }
 0x3ee   :  { %990 = vsyncpa [#allocation3], 1 }
 0x3ef   :  { %992 = vsyncpa [#allocation3 + $0x1], 1 }
 0x3f0   :  { %993 = vsyncpa [#allocation5], 1 }
 0x3f1   :  { %995 = vsyncpa [#allocation5 + $0x1], 1 }

</bundles_post_ra>
